<compile_context>
chip_gen: v6e
topology: v6e:2x2x1
jax: 0.10.0
libtpu: 0.0.40
codegen_flags: <defaults>
</compile_context>

<pallas_src>
import functools
import math

import jax
import jax.numpy as jnp
import numpy as np
from jax import lax
from jax.experimental import pallas as pl
from jax.experimental.pallas import tpu as pltpu


_VMEM_LIMIT_BYTES = 48 * 1024 * 1024  # < 64 MiB (v7x physical), > default scoped limits


def _pick_tile(dim, pref, align):
    """Largest tile <= pref that is a multiple of `align` and divides `dim`;
    falls back to the full dimension (always a legal block shape)."""
    if dim <= pref:
        return dim
    t = (pref // align) * align
    while t >= align:
        if dim % t == 0:
            return t
        t -= align
    return dim


# ----------------------------------------------------------------------------
# Tiled, pipelined GEMM:  out = x @ w_t      (w_t already stored as (K, N))
# ----------------------------------------------------------------------------
def _matmul_kernel(x_ref, w_ref, o_ref, acc_ref):
    @pl.when(pl.program_id(2) == 0)
    def _():
        acc_ref[...] = jnp.zeros_like(acc_ref)

    acc_ref[...] += jnp.dot(x_ref[...], w_ref[...],
                            preferred_element_type=jnp.float32)

    @pl.when(pl.program_id(2) == pl.num_programs(2) - 1)
    def _():
        o_ref[...] = acc_ref[...].astype(o_ref.dtype)


def matmul(x, w_t, *, tm=512, tn=512, tk=512):
    M, K = x.shape
    K2, N = w_t.shape
    assert K == K2
    tm = _pick_tile(M, tm, 16)     # 16-row alignment (bf16 sublane packing)
    tn = _pick_tile(N, tn, 128)
    tk = _pick_tile(K, tk, 128)
    grid = (M // tm, N // tn, K // tk)
    return pl.pallas_call(
        _matmul_kernel,
        grid=grid,
        in_specs=[pl.BlockSpec((tm, tk), lambda i, j, k: (i, k)),
                  pl.BlockSpec((tk, tn), lambda i, j, k: (k, j))],
        out_specs=pl.BlockSpec((tm, tn), lambda i, j, k: (i, j)),
        out_shape=jax.ShapeDtypeStruct((M, N), x.dtype),
        scratch_shapes=[pltpu.VMEM((tm, tn), jnp.float32)],
        compiler_params=pltpu.CompilerParams(
            dimension_semantics=("parallel", "parallel", "arbitrary"),
            vmem_limit_bytes=_VMEM_LIMIT_BYTES),
    )(x, w_t)


# ----------------------------------------------------------------------------
# Flash-style grouped attention with in-kernel rotary embedding.
#   q: (B, S, n_heads*hd)   k, v: (B, S, n_kv_heads*hd)   (row-major GEMM layout)
# q/k projection weights were de-interleaved per head ([pair-reals | pair-imags]),
# the same permutation on q and k, so q.k^T matches the interleaved formulation.
# Grid = (batch, q_tile, kv_tile); all kv-head groups are processed per step, so
# no head-major transposes are needed around this kernel.
# ----------------------------------------------------------------------------
def _flash_kernel(q_ref, k_ref, v_ref, cq_ref, sq_ref, ck_ref, sk_ref, o_ref,
                  qrot, krot, m_sc, l_sc, acc_sc,
                  *, scale, causal, n_heads, n_kv_heads, tq, tkv, hd):
    n_rep = n_heads // n_kv_heads
    hd2 = hd // 2
    qi = pl.program_id(1)
    ki = pl.program_id(2)
    cdt = q_ref.dtype  # compute dtype (bf16 models stay bf16 on the MXU)

    # ---- once per q-tile (ki == 0): init softmax state, rope + pre-scale Q ----
    @pl.when(ki == 0)
    def _():
        m_sc[...] = jnp.full(m_sc.shape, -jnp.inf, m_sc.dtype)
        l_sc[...] = jnp.zeros(l_sc.shape, l_sc.dtype)
        acc_sc[...] = jnp.zeros(acc_sc.shape, acc_sc.dtype)
        cq = cq_ref[...]                       # (tq, hd2), compute dtype
        sq = sq_ref[...]
        qblk = q_ref[0]                        # (tq, n_heads*hd)
        for h in range(n_heads):
            qe = qblk[:, h * hd:h * hd + hd2]
            qo = qblk[:, h * hd + hd2:(h + 1) * hd]
            qrot[h * tq:(h + 1) * tq, :hd2] = ((qe * cq - qo * sq) * scale).astype(cdt)
            qrot[h * tq:(h + 1) * tq, hd2:] = ((qe * sq + qo * cq) * scale).astype(cdt)

    def step(masked):
        ck = ck_ref[...]                       # (tkv, hd2)
        sk = sk_ref[...]
        kblk = k_ref[0]                        # (tkv, n_kv_heads*hd)
        vblk = v_ref[0]
        if masked:
            rows = lax.broadcasted_iota(jnp.int32, (n_rep * tq, tkv), 0) % tq + qi * tq
            cols = lax.broadcasted_iota(jnp.int32, (n_rep * tq, tkv), 1) + ki * tkv
            vis = cols <= rows
        for g in range(n_kv_heads):
            # rope this kv head into scratch (no concatenate / relayout)
            ke = kblk[:, g * hd:g * hd + hd2]
            ko = kblk[:, g * hd + hd2:(g + 1) * hd]
            krot[:, :hd2] = (ke * ck - ko * sk).astype(cdt)
            krot[:, hd2:] = (ke * sk + ko * ck).astype(cdt)
            kr = krot[...]                     # (tkv, hd)

            r0, r1 = g * n_rep * tq, (g + 1) * n_rep * tq
            qg = qrot[r0:r1, :]                # n_rep query heads stacked on MXU M dim
            s = lax.dot_general(qg, kr, (((1,), (1,)), ((), ())),
                                preferred_element_type=jnp.float32)  # (n_rep*tq, tkv)
            if masked:
                s = jnp.where(vis, s, -jnp.inf)

            m_prev = m_sc[r0:r1, :]
            m_new = jnp.maximum(m_prev, jnp.max(s, axis=-1, keepdims=True))
            alpha = jnp.exp(m_prev - m_new)
            p = jnp.exp(s - m_new)
            l_sc[r0:r1, :] = alpha * l_sc[r0:r1, :] + jnp.sum(p, axis=-1, keepdims=True)
            acc_sc[r0:r1, :] = alpha * acc_sc[r0:r1, :] + lax.dot_general(
                p.astype(cdt), vblk[:, g * hd:(g + 1) * hd], (((1,), (0,)), ((), ())),
                preferred_element_type=jnp.float32)
            m_sc[r0:r1, :] = m_new

    if causal:
        row_first = qi * tq
        row_last = qi * tq + (tq - 1)
        col_first = ki * tkv
        col_last = ki * tkv + (tkv - 1)
        fully_visible = col_last <= row_first             # interior block: no mask needed
        partly_visible = jnp.logical_and(col_first <= row_last,
                                         jnp.logical_not(fully_visible))
        pl.when(fully_visible)(lambda: step(False))
        pl.when(partly_visible)(lambda: step(True))
        # fully-masked blocks: nothing runs (their K/V DMA is also clamped away)
    else:
        step(False)

    @pl.when(ki == pl.num_programs(2) - 1)
    def _():
        l = l_sc[...]
        inv = pl.reciprocal(l, approx=True)
        inv = inv * (2.0 - l * inv)            # one Newton step -> full f32 accuracy
        out = acc_sc[...] * inv                # (n_heads*tq, hd) f32
        # write directly into the (tq, n_heads*hd) layout the wo GEMM consumes
        for h in range(n_heads):
            o_ref[0, :, h * hd:(h + 1) * hd] = (
                out[h * tq:(h + 1) * tq, :].astype(o_ref.dtype))


def flash_attention(q, k, v, pos_cos, pos_sin, *, n_heads, n_kv_heads, causal,
                    tq_pref=128, tkv_pref=256):
    B, S, Nq = q.shape
    Skv = k.shape[1]
    Nk = k.shape[2]
    hd = Nq // n_heads
    hd2 = hd // 2
    n_rep = n_heads // n_kv_heads
    assert Nk == n_kv_heads * hd

    # cap the stacked-head MXU M dimension (n_rep * tq) at ~512 rows
    tq_pref = max(16, min(tq_pref, 512 // max(n_rep, 1)))
    tq = _pick_tile(S, tq_pref, 16)
    tkv = _pick_tile(Skv, tkv_pref, 128)

    # keep the MXU in the activation dtype (bf16 models stay bf16)
    cos = pos_cos.astype(q.dtype)
    sin = pos_sin.astype(q.dtype)

    if causal:
        def kv_block(qi, ki):
            # last kv block that is not fully masked for this q tile; clamping makes
            # Pallas re-request the previous block (DMA skipped) on masked steps.
            last = (qi * tq + (tq - 1)) // tkv
            return jnp.minimum(ki, last)
    else:
        def kv_block(qi, ki):
            return ki

    kernel = functools.partial(
        _flash_kernel, scale=1.0 / math.sqrt(hd), causal=causal,
        n_heads=n_heads, n_kv_heads=n_kv_heads, tq=tq, tkv=tkv, hd=hd)

    grid = (B, S // tq, Skv // tkv)
    return pl.pallas_call(
        kernel,
        grid=grid,
        in_specs=[
            pl.BlockSpec((1, tq, Nq), lambda b, qi, ki: (b, qi, 0)),
            pl.BlockSpec((1, tkv, Nk), lambda b, qi, ki: (b, kv_block(qi, ki), 0)),
            pl.BlockSpec((1, tkv, Nk), lambda b, qi, ki: (b, kv_block(qi, ki), 0)),
            pl.BlockSpec((tq, hd2), lambda b, qi, ki: (qi, 0)),
            pl.BlockSpec((tq, hd2), lambda b, qi, ki: (qi, 0)),
            pl.BlockSpec((tkv, hd2), lambda b, qi, ki: (kv_block(qi, ki), 0)),
            pl.BlockSpec((tkv, hd2), lambda b, qi, ki: (kv_block(qi, ki), 0)),
        ],
        out_specs=pl.BlockSpec((1, tq, Nq), lambda b, qi, ki: (b, qi, 0)),
        out_shape=jax.ShapeDtypeStruct((B, S, Nq), q.dtype),
        scratch_shapes=[
            pltpu.VMEM((n_heads * tq, hd), q.dtype),      # roped + pre-scaled Q
            pltpu.VMEM((tkv, hd), q.dtype),               # roped K (one kv head)
            pltpu.VMEM((n_heads * tq, 1), jnp.float32),   # running max
            pltpu.VMEM((n_heads * tq, 1), jnp.float32),   # running denom
            pltpu.VMEM((n_heads * tq, hd), jnp.float32),  # output accumulator
        ],
        compiler_params=pltpu.CompilerParams(
            dimension_semantics=("parallel", "parallel", "arbitrary"),
            vmem_limit_bytes=_VMEM_LIMIT_BYTES),
    )(q, k, v, cos, sin, cos, sin)


# ----------------------------------------------------------------------------
# One-time parameter preparation (model-load time, not per forward call)
# ----------------------------------------------------------------------------
def prepare_attention_params(params, *, n_heads, n_kv_heads):
    """Re-orders q/k projection rows per head to [pair-reals | pair-imags] (so the
    rope kernel uses contiguous half-width slices; the identical permutation on q
    and k leaves q.k^T unchanged) and pre-transposes all weights to (K, N)."""
    H = params["wq"].shape[1]
    hd = params["wq"].shape[0] // n_heads

    def deinterleave_rows(w, nh):
        return (w.reshape(nh, hd // 2, 2, H)
                 .transpose(0, 2, 1, 3)
                 .reshape(nh * hd, H))

    return {
        "wq_t": deinterleave_rows(params["wq"], n_heads).T,
        "wk_t": deinterleave_rows(params["wk"], n_kv_heads).T,
        "wv_t": params["wv"].T,
        "wo_t": params["wo"].T,
        "n_heads": n_heads,
        "n_kv_heads": n_kv_heads,
        "head_size": hd,
    }


# ----------------------------------------------------------------------------
# Full forward (prefill, past_key_value=None)
# ----------------------------------------------------------------------------
def yuanmeng_attention_forward(x, pos_cos, pos_sin, prep):
    # TODO(synk): past_key_value / use_cache KV-cache concat (decode) path not implemented.
    B, S, H = x.shape
    n_heads = prep["n_heads"]
    n_kv_heads = prep["n_kv_heads"]
    hd = prep["head_size"]

    x2 = x.reshape(B * S, H)
    # Projection GEMMs whose outputs are already in the layout the attention kernel
    # consumes ((B, S, heads*hd) row-major) -> no XLA transposes between pallas_calls.
    q = matmul(x2, prep["wq_t"]).reshape(B, S, n_heads * hd)
    k = matmul(x2, prep["wk_t"]).reshape(B, S, n_kv_heads * hd)
    v = matmul(x2, prep["wv_t"]).reshape(B, S, n_kv_heads * hd)

    o = flash_attention(q, k, v, pos_cos, pos_sin,
                        n_heads=n_heads, n_kv_heads=n_kv_heads, causal=(S != 1))

    return matmul(o.reshape(B * S, n_heads * hd), prep["wo_t"]).reshape(B, S, H)


# ----------------------------------------------------------------------------
# Pure-JAX reference mirroring the PyTorch module exactly
# ----------------------------------------------------------------------------
def reference_forward(x, pos_cos, pos_sin, params, *, n_heads, n_kv_heads):
    B, S, H = x.shape
    hd = H // n_heads
    n_rep = n_heads // n_kv_heads

    xq = (x.reshape(B * S, H) @ params["wq"].T).reshape(B, S, n_heads, hd)
    xk = (x.reshape(B * S, H) @ params["wk"].T).reshape(B, S, n_kv_heads, hd)
    xv = (x.reshape(B * S, H) @ params["wv"].T).reshape(B, S, n_kv_heads, hd)

    def rope(t):
        tr = t.reshape(*t.shape[:-1], hd // 2, 2)
        a, b = tr[..., 0], tr[..., 1]
        c = pos_cos[None, :, None, :]
        s = pos_sin[None, :, None, :]
        out = jnp.stack([a * c - b * s, a * s + b * c], axis=-1)
        return out.reshape(*t.shape)

    xq, xk = rope(xq), rope(xk)
    xk = jnp.repeat(xk, n_rep, axis=2)
    xv = jnp.repeat(xv, n_rep, axis=2)

    q = xq.transpose(0, 2, 1, 3)
    k = xk.transpose(0, 2, 1, 3)
    v = xv.transpose(0, 2, 1, 3)
    scale = 1.0 / math.sqrt(hd)
    s = jnp.einsum("bhqd,bhkd->bhqk", q, k) * scale
    if S != 1:
        mask = jnp.tril(jnp.ones((S, S), dtype=bool))
        s = jnp.where(mask, s, -jnp.inf)
    p = jax.nn.softmax(s, axis=-1)
    o = jnp.einsum("bhqk,bhkd->bhqd", p, v)
    o = o.transpose(0, 2, 1, 3).reshape(B, S, n_heads * hd)
    return (o @ params["wo"].T).reshape(B, S, H)


# ----------------------------------------------------------------------------
def _run_case(key, *, B, S, H, n_heads, n_kv_heads, atol):
    hd = H // n_heads
    k1, k2, k3, k4, k5 = jax.random.split(key, 5)

    def init_w(kk, out_f, in_f):
        bound = 1.0 / math.sqrt(in_f)
        return jax.random.uniform(kk, (out_f, in_f), jnp.float32, -bound, bound)

    params = {
        "wq": init_w(k1, n_heads * hd, H),
        "wk": init_w(k2, n_kv_heads * hd, H),
        "wv": init_w(k3, n_kv_heads * hd, H),
        "wo": init_w(k4, H, n_heads * hd),
    }
    x = jax.random.normal(k5, (B, S, H), jnp.float32)

    # pos_cis (complex) represented as cos/sin of shape (S, head_size // 2)
    theta = 10000.0
    freqs = 1.0 / (theta ** (jnp.arange(0, hd, 2, dtype=jnp.float32) / hd))
    angles = jnp.outer(jnp.arange(S, dtype=jnp.float32), freqs)
    pos_cos, pos_sin = jnp.cos(angles), jnp.sin(angles)

    prep = prepare_attention_params(params, n_heads=n_heads, n_kv_heads=n_kv_heads)
    out = yuanmeng_attention_forward(x, pos_cos, pos_sin, prep)
    out = jax.block_until_ready(out)

    ref = reference_forward(x, pos_cos, pos_sin, params,
                            n_heads=n_heads, n_kv_heads=n_kv_heads)
    assert np.allclose(np.asarray(out), np.asarray(ref), atol=atol, rtol=atol), (
        f"Pallas output does not match reference for B={B} S={S} H={H}")


if __name__ == "__main__":
    # small shape matching the module spec
    _run_case(jax.random.PRNGKey(0), B=2, S=8, H=32, n_heads=4, n_kv_heads=2, atol=1e-4)
    # larger case exercising multi-block tiling, the causal fast/masked/skip paths
    # and the clamped K/V index_map
    _run_case(jax.random.PRNGKey(0), B=1, S=512, H=64, n_heads=4, n_kv_heads=2, atol=5e-4)
    print("KERNEL_OK")
</pallas_src>

<mosaic_0001>
module attributes {stable_mosaic.version = 11 : i64} {
  func.func @_matmul_kernel(%arg0: i32, %arg1: i32, %arg2: i32, %arg3: memref<16x32xf32, #tpu.memory_space<vmem>>, %arg4: memref<32x32xf32, #tpu.memory_space<vmem>>, %arg5: memref<16x32xf32, #tpu.memory_space<vmem>>, %arg6: memref<16x32xf32, #tpu.memory_space<vmem>>) attributes {dimension_semantics = [#tpu.dimension_semantics<parallel>, #tpu.dimension_semantics<parallel>, #tpu.dimension_semantics<arbitrary>], iteration_bounds = array<i64: 1, 1, 1>, scalar_prefetch = 0 : i64, scratch_operands = 1 : i64, tpu.core_type = #tpu.core_type<tc>, window_params = [{transform_indices = @transform_0, window_bounds = array<i64: 16, 32>}, {transform_indices = @transform_1, window_bounds = array<i64: 32, 32>}, {transform_indices = @transform_2, window_bounds = array<i64: 16, 32>}]} {
    %c0_i32 = arith.constant 0 : i32
    %0 = arith.cmpi eq, %arg2, %c0_i32 : i32
    %1 = arith.extui %0 : i1 to i32
    %c0_i32_0 = arith.constant 0 : i32
    %2 = arith.cmpi ne, %1, %c0_i32_0 : i32
    scf.if %2 {
      %cst_10 = arith.constant 0.000000e+00 : f32
      %12 = vector.broadcast %cst_10 : f32 to vector<16x32xf32>
      %c0_11 = arith.constant 0 : index
      %c0_12 = arith.constant 0 : index
      %13 = vector.load %arg6[%c0_11, %c0_12] : memref<16x32xf32, #tpu.memory_space<vmem>>, vector<16x32xf32>
      tpu.vector_store %arg6[%c0_11, %c0_12], %12 {strides = array<i32>} : memref<16x32xf32, #tpu.memory_space<vmem>>, vector<16x32xf32>,
    } else {
    }
    %c0 = arith.constant 0 : index
    %c0_1 = arith.constant 0 : index
    %3 = vector.load %arg6[%c0, %c0_1] : memref<16x32xf32, #tpu.memory_space<vmem>>, vector<16x32xf32>
    %c0_2 = arith.constant 0 : index
    %c0_3 = arith.constant 0 : index
    %4 = vector.load %arg3[%c0_2, %c0_3] : memref<16x32xf32, #tpu.memory_space<vmem>>, vector<16x32xf32>
    %c0_4 = arith.constant 0 : index
    %c0_5 = arith.constant 0 : index
    %5 = vector.load %arg4[%c0_4, %c0_5] : memref<32x32xf32, #tpu.memory_space<vmem>>, vector<32x32xf32>
    %cst = arith.constant dense<0.000000e+00> : vector<16x32xf32>
    %6 = tpu.matmul %4, %5, %cst {dimension_numbers = #tpu.dot_dimension_numbers<[1], [0], [0], [1], [0, 0, 1, 1], [], []>} : vector<16x32xf32>, vector<32x32xf32>, vector<16x32xf32> -> vector<16x32xf32>
    %7 = arith.addf %3, %6 : vector<16x32xf32>
    %c0_6 = arith.constant 0 : index
    %c0_7 = arith.constant 0 : index
    %8 = vector.load %arg6[%c0_6, %c0_7] : memref<16x32xf32, #tpu.memory_space<vmem>>, vector<16x32xf32>
    tpu.vector_store %arg6[%c0_6, %c0_7], %7 {strides = array<i32>} : memref<16x32xf32, #tpu.memory_space<vmem>>, vector<16x32xf32>,
    %c0_i32_8 = arith.constant 0 : i32
    %9 = arith.cmpi eq, %arg2, %c0_i32_8 : i32
    %10 = arith.extui %9 : i1 to i32
    %c0_i32_9 = arith.constant 0 : i32
    %11 = arith.cmpi ne, %10, %c0_i32_9 : i32
    scf.if %11 {
      %c0_10 = arith.constant 0 : index
      %c0_11 = arith.constant 0 : index
      %12 = vector.load %arg6[%c0_10, %c0_11] : memref<16x32xf32, #tpu.memory_space<vmem>>, vector<16x32xf32>
      %c0_12 = arith.constant 0 : index
      %c0_13 = arith.constant 0 : index
      %13 = vector.load %arg5[%c0_12, %c0_13] : memref<16x32xf32, #tpu.memory_space<vmem>>, vector<16x32xf32>
      tpu.vector_store %arg5[%c0_12, %c0_13], %12 {strides = array<i32>} : memref<16x32xf32, #tpu.memory_space<vmem>>, vector<16x32xf32>,
    } else {
    }
    return
  }
  func.func @transform_0(%arg0: i32, %arg1: i32, %arg2: i32) -> (i32, i32) {
    %c0_i32 = arith.constant 0 : i32
    return %arg0, %arg2 : i32, i32
  }
  func.func @transform_1(%arg0: i32, %arg1: i32, %arg2: i32) -> (i32, i32) {
    %c0_i32 = arith.constant 0 : i32
    return %arg2, %arg1 : i32, i32
  }
  func.func @transform_2(%arg0: i32, %arg1: i32, %arg2: i32) -> (i32, i32) {
    %c0_i32 = arith.constant 0 : i32
    return %arg0, %arg1 : i32, i32
  }
}

</mosaic_0001>

<bundles_post_ra>
// kernel: tpu_custom_call.1
= control target key start
LH: loop header
LB: loop body
LE: loop exit
PB: predicated region body
PF: predicated region fallthrough
CT: control target
= control target key end

     0   :  { %7 = vsyncpa [#allocation4], 0  ;;  %s304_s0 = inlined_call_operand.hbm [shape: f32[16,32], index: 0, kind: input, shape index: {}]   ;;  %s305_s1 = inlined_call_operand.hbm [shape: f32[32,32], index: 1, kind: input, shape index: {}]   ;;  %s306_s2 = inlined_call_operand.hbm [shape: f32[16,32], index: 2, kind: output, shape index: {}]  }
   0x1   :  { %8 = vsyncpa [#allocation7], 0 }
   0x2   :  { %9 = vsyncpa [#allocation5], 0  ;;  %s257_s9 = smov [#allocation3]  }
   0x3   :  { %s15_s10 = sshll.u32 %s257_s9, 4  ;;  %s16_s10 = int_to_ptr.vmem [resolvable:$true] %s15_s10 }
   0x4   :  { %s199_s11 = scalar_lea.vmem %s16_s10, 256  ;;  %p204_p1 = scmp.lt.s32.totalorder %s16_s10, %s16_s10 }
   0x5   :  { %p200_p0 = scmp.ne.s32.totalorder %s16_s10, %s199_s11  ;;  %p205_p2 = scmp.lt.s32.totalorder %s199_s11, %s199_s11 }
   0x7   :  { %p206_p3 = por %p205_p2, %p204_p1 }
   0x9   :  { %p207_p4 = pnand %p206_p3, %p200_p0 }
   0xb   :  { %210 = shalt.err (!%p207_p4)
}
   0xc   :  { %s258_s12 = smov 128   ;;  %s259_s13 = smov 8  }
   0xd   :  { %21 = dma.hbm_to_vmem [thread:$0]  %s304_s0, 256, %s16_s10, [#allocation4], %s258_s12, %s258_s12, %s259_s13  }
   0xe   :  { %s260_s16 = smov [#allocation6]  }
   0xf   :  { %s27_s17 = sshll.u32 %s260_s16, 4  ;;  %s28_s17 = int_to_ptr.vmem [resolvable:$true] %s27_s17 }
  0x10   :  { %s219_s18 = scalar_lea.vmem %s28_s17, 512  ;;  %p224_p6 = scmp.lt.s32.totalorder %s28_s17, %s28_s17 }
  0x11   :  { %p220_p5 = scmp.ne.s32.totalorder %s28_s17, %s219_s18  ;;  %p225_p7 = scmp.lt.s32.totalorder %s219_s18, %s219_s18 }
  0x13   :  { %p226_p8 = por %p225_p7, %p224_p6 }
  0x15   :  { %p227_p9 = pnand %p226_p8, %p220_p5 }
  0x17   :  { %230 = shalt.err (!%p227_p9)
}
  0x18   :  { %33 = dma.hbm_to_vmem [thread:$0]  %s305_s1, 512, %s28_s17, [#allocation7], %s258_s12, %s258_s12, %s259_s13  }
  0x19   :  { %251 = dma.done.wait [#allocation4], 256  }
  0x1a   :  { %252 = vsyncadd [#allocation4], 4294967040 }
  0x1b   :  { %253 = dma.done.wait [#allocation7], 512  }
  0x1c   :  { %254 = vsyncadd [#allocation7], 4294966784  ;;  %vm44_vm0 = vcmask 261120   ;;  %v261_v0 = vmov 0.0   ;;  %v54_v1 = vld [vmem:[#allocation6 + $0x18] sm:$0xff]  ;;  %v53_v2 = vld [vmem:[#allocation6 + $0x10] sm:$0xff] }
  0x1d   :  { %46 = vst.msk [vmem:[#allocation2 + $0x8] sm:$0xff] %vm44_vm0, %v261_v0  ;;  %45 = vst.msk [vmem:[#allocation2] sm:$0xff] %vm44_vm0, %v261_v0  ;;  %174 = vmatprep.subr.mxu0 %v54_v1  ;;  %v49_v3 = vld [vmem:[#allocation3] sm:$0xff]  ;;  %v52_v4 = vld [vmem:[#allocation6 + $0x8] sm:$0xff]  ;;  %s262_s0 = smov [#allocation8]  }
  0x1e   :  { %175 = vmatpush3.msra.mxu0 %v54_v1  ;;  %182 = vmatprep.mubr.msk.f32.mxu0 %vm44_vm0, %v49_v3  ;;  %v51_v5 = vld [vmem:[#allocation6] sm:$0xff]  ;;  %v50_v6 = vld [vmem:[#allocation3 + $0x8] sm:$0xff]  ;;  %s153_s1 = sshll.u32 %s262_s0, 4  ;;  %s154_s1 = int_to_ptr.vmem [resolvable:$true] %s153_s1 }
  0x1f   :  { %176 = vmatprep.subr.mxu0 %v53_v2  ;;  %s231_s21 = scalar_lea.vmem %s154_s1, 256  ;;  %p236_p11 = scmp.lt.s32.totalorder %s154_s1, %s154_s1 }
  0x20   :  { %177 = vmatpush3.msra.mxu0 %v53_v2  ;;  %p232_p10 = scmp.ne.s32.totalorder %s154_s1, %s231_s21  ;;  %p237_p12 = scmp.lt.s32.totalorder %s231_s21, %s231_s21 }
  0x21   :  { %178 = vmatprep.subr.mxu0 %v52_v4 }
  0x22   :  { %179 = vmatpush3.msra.mxu0 %v52_v4  ;;  %p238_p13 = por %p237_p12, %p236_p11 }
  0x23   :  { %180 = vmatprep.subr.mxu0 %v51_v5 }
  0x24   :  { %181 = vmatpush3.msra.mxu0 %v51_v5  ;;  %v48_v7 = vld [vmem:[#allocation2 + $0x8] sm:$0xff]  ;;  %v47_v9 = vld [vmem:[#allocation2] sm:$0xff]  ;;  %p239_p0 = pnand %p238_p13, %p232_p10 }
  0x25   :  { %183 = vmatmul.mubr.msk.f32.vlgmr.msra.gmra.mxu0 %vm44_vm0, %v50_v6 }
  0xe5   :  { %v184_v8 = vpop.f32.mrf.mxu0 }
  0xe6   :  { %v138_v10 = vadd.f32 %v184_v8, %v48_v7 }
  0xe7   :  { %v128_v11 = vpop.f32.mrf.mxu0 }
  0xe8   :  { %140 = vst.msk [vmem:[#allocation2 + $0x8] sm:$0xff] %vm44_vm0, %v138_v10  ;;  %v137_v12 = vadd.f32 %v128_v11, %v47_v9 }
  0xea   :  { %139 = vst.msk [vmem:[#allocation2] sm:$0xff] %vm44_vm0, %v137_v12 }
  0xef   :  { %v145_v13 = vld [vmem:[#allocation2 + $0x8] sm:$0xff] }
  0xf0   :  { %147 = vst.msk [vmem:[#allocation8 + $0x8] sm:$0xff] %vm44_vm0, %v145_v13 }
  0xf1   :  { %v144_v14 = vld [vmem:[#allocation2] sm:$0xff] }
  0xf2   :  { %146 = vst.msk [vmem:[#allocation8] sm:$0xff] %vm44_vm0, %v144_v14 }
  0xf3   :  { %242 = shalt.err (!%p239_p0)
}
  0xf4   :  { %159 = dma.vmem_to_hbm [thread:$0]  %s154_s1, 256, %s306_s2, [#allocation5], %s258_s12, %s258_s12, %s259_s13  }
  0xf5   :  { %255 = dma.done.wait [#allocation5], 256  }
  0xf6   :  { %256 = vsyncadd [#allocation5], 4294967040 }
  0xf7   :  { %163 = vsyncpa [#allocation4], 1 }
  0xf8   :  { %164 = vsyncpa [#allocation7], 1 }
  0xf9   :  { %165 = vsyncpa [#allocation5], 1 }

</bundles_post_ra>
